<compile_context>
chip_gen: v5e
topology: v5e:2x2
jax: 0.10.0
libtpu: 0.0.40
codegen_flags: <defaults>
</compile_context>

<pallas_src>
import jax
import jax.numpy as jnp
from jax.experimental import pallas as pl
from jax.experimental.pallas import tpu as pltpu

TILE_M_MAX = 512      # max row tile of A (output rows per grid step)
TILE_K_MAX = 1024     # max reduction tile over A's columns
TILE_MIN = 256        # smallest tile (respects the (8,128) layout constraint)
D_PAD = 128           # lane-dense padded feature width (hidden=16 / classes)
VMEM_LIMIT = 32 * 1024 * 1024   # safe on v5e/v6e/v7x; actual usage is far below


def _round_up(x, m):
    return ((x + m - 1) // m) * m


def _pick_tile(cap, base):
    """Largest 256*2^j tile <= min(cap, base)."""
    t = TILE_MIN
    while t * 2 <= min(cap, base):
        t *= 2
    return t


def _make_agg_kernel(tk, apply_relu, fuse_w2):
    """out = A @ feats + b (optionally ReLU'd; optionally also emits out @ W2).

    a_ref:   (TM, TK)      bf16  -- tile of normalized adjacency
    f_ref:   (n_pad, 128)  bf16  -- whole pre-transformed features, resident
    b_ref:   (1, 128)      f32   -- bias (zero-padded lanes)
    [w2_ref: (128, 128)    bf16] -- zero-padded W2 (fused layer-2 pre-transform)
    o_ref:   (TM, 128)     f32   -- output block, doubles as the accumulator
    [hw2_ref:(TM, 128)     bf16] -- out @ W2, feeds layer 2 directly
    """
    def kernel(a_ref, f_ref, b_ref, *rest):
        if fuse_w2:
            w2_ref, o_ref, hw2_ref = rest
        else:
            (o_ref,) = rest
        k = pl.program_id(1)

        @pl.when(k == 0)
        def _():
            o_ref[...] = jnp.zeros_like(o_ref)

        off = pl.multiple_of(k * tk, tk)
        o_ref[...] += jnp.dot(a_ref[...], f_ref[pl.ds(off, tk), :],
                              preferred_element_type=jnp.float32)

        @pl.when(k == pl.num_programs(1) - 1)
        def _():
            r = o_ref[...] + b_ref[...]
            if apply_relu:
                r = jnp.maximum(r, 0.0)
            o_ref[...] = r
            if fuse_w2:
                hw2_ref[...] = jnp.dot(
                    r.astype(jnp.bfloat16), w2_ref[...],
                    preferred_element_type=jnp.float32).astype(hw2_ref.dtype)

    return kernel


def _aggregate(a_bf16, feats_bf16, bias_f32, w2_bf16=None, *,
               tm, tk, apply_relu):
    """Pallas-tiled  A @ feats + bias  (+ optional ReLU / fused @W2)."""
    n_pad = a_bf16.shape[0]
    d = feats_bf16.shape[1]
    fuse_w2 = w2_bf16 is not None
    grid = (n_pad // tm, n_pad // tk)

    in_specs = [
        pl.BlockSpec((tm, tk), lambda i, k: (i, k)),      # A row/K tile
        pl.BlockSpec((n_pad, d), lambda i, k: (0, 0)),    # feats: resident, 1 DMA
        pl.BlockSpec((1, d), lambda i, k: (0, 0)),        # bias
    ]
    operands = [a_bf16, feats_bf16, bias_f32]
    if fuse_w2:
        in_specs.append(pl.BlockSpec((d, d), lambda i, k: (0, 0)))  # W2 resident
        operands.append(w2_bf16)
        out_shape = (jax.ShapeDtypeStruct((n_pad, d), jnp.float32),
                     jax.ShapeDtypeStruct((n_pad, d), jnp.bfloat16))
        out_specs = [pl.BlockSpec((tm, d), lambda i, k: (i, 0)),
                     pl.BlockSpec((tm, d), lambda i, k: (i, 0))]
    else:
        out_shape = jax.ShapeDtypeStruct((n_pad, d), jnp.float32)
        out_specs = pl.BlockSpec((tm, d), lambda i, k: (i, 0))

    return pl.pallas_call(
        _make_agg_kernel(tk, apply_relu, fuse_w2),
        out_shape=out_shape,
        grid_spec=pltpu.PrefetchScalarGridSpec(
            num_scalar_prefetch=0,
            grid=grid,
            in_specs=in_specs,
            out_specs=out_specs,
        ),
        compiler_params=pltpu.CompilerParams(
            dimension_semantics=("parallel", "arbitrary"),
            vmem_limit_bytes=VMEM_LIMIT,
        ),
    )(*operands)


def gcn_forward(x, edge_index, edge_weight, w1, b1, w2, b2):
    N, _ = x.shape
    H = w1.shape[1]
    C = w2.shape[1]

    base = _round_up(N, TILE_MIN)
    tk = _pick_tile(TILE_K_MAX, base)
    tm = _pick_tile(TILE_M_MAX, base)
    n_pad = _round_up(N, max(tm, tk))   # divisible by both tm and tk

    # ---- gcn_norm (plain-JAX glue): add self loops + symmetric normalization
    loop_idx = jnp.arange(N, dtype=edge_index.dtype)
    ei = jnp.concatenate([edge_index, jnp.stack([loop_idx, loop_idx])], axis=1)
    ew = jnp.concatenate(
        [edge_weight, jnp.ones((N,), dtype=edge_weight.dtype)])
    row, col = ei[0], ei[1]
    deg = jnp.zeros((N,), dtype=ew.dtype).at[col].add(ew)
    deg_inv_sqrt = deg ** -0.5
    deg_inv_sqrt = jnp.where(jnp.isinf(deg_inv_sqrt), 0.0, deg_inv_sqrt)
    norm = deg_inv_sqrt[row] * ew * deg_inv_sqrt[col]

    # Dense normalized adjacency scattered directly into its streaming dtype
    # (out[col] += norm * msg[row]  == GCNConv source_to_target scatter-add).
    # Note: duplicate parallel edges accumulate in bf16 precision (minor).
    A_bf16 = jnp.zeros((n_pad, n_pad), jnp.bfloat16).at[col, row].add(
        norm.astype(jnp.bfloat16))

    # ---- layer 1 (fused with layer-2 pre-transform):
    #   hidden = relu(A @ (X @ W1) + b1);   hw2 = hidden @ W2
    xw1 = x.astype(jnp.float32) @ w1.astype(jnp.float32)     # tiny K=F GEMM, XLA
    xw1_pad = jnp.zeros((n_pad, D_PAD), jnp.bfloat16).at[:N, :H].set(
        xw1.astype(jnp.bfloat16))
    b1_pad = jnp.zeros((1, D_PAD), jnp.float32).at[0, :H].set(
        b1.astype(jnp.float32))
    w2_pad = jnp.zeros((D_PAD, D_PAD), jnp.bfloat16).at[:H, :C].set(
        w2.astype(jnp.bfloat16))

    hidden_pad, hw2_pad = _aggregate(A_bf16, xw1_pad, b1_pad, w2_pad,
                                     tm=tm, tk=tk, apply_relu=True)
    hidden = hidden_pad[:N, :H]

    # TODO(synk): F.dropout(p=0.5) is identity in eval mode; training-mode
    # dropout not applied.

    # ---- layer 2: logits = A @ (hidden @ W2) + b2
    # Rows >= N of hw2_pad may be nonzero (bias in pad rows), but A's padded
    # columns are all zero so they never contribute.
    b2_pad = jnp.zeros((1, D_PAD), jnp.float32).at[0, :C].set(
        b2.astype(jnp.float32))
    logits_pad = _aggregate(A_bf16, hw2_pad, b2_pad,
                            tm=tm, tk=tk, apply_relu=False)
    logits = logits_pad[:N, :C]
    return logits, hidden


if __name__ == "__main__":
    # Small, deterministic problem: num_nodes=16, num_features=8,
    # hidden=16 (fixed by the module), num_classes=4, 32 directed edges.
    N, F, H, C, E = 16, 8, 16, 4, 32

    key = jax.random.PRNGKey(0)
    k_x, k_src, k_dst, k_w1, k_w2 = jax.random.split(key, 5)

    x = jax.random.normal(k_x, (N, F), dtype=jnp.float32)
    src = jax.random.randint(k_src, (E,), 0, N, dtype=jnp.int32)
    dst = jax.random.randint(k_dst, (E,), 0, N, dtype=jnp.int32)
    edge_index = jnp.stack([src, dst])                  # (2, E)
    edge_weight = jnp.ones((E,), dtype=jnp.float32)     # (E,)

    # GCNConv weights (glorot-uniform-ish, deterministic); biases zero.
    lim1 = (6.0 / (F + H)) ** 0.5
    lim2 = (6.0 / (H + C)) ** 0.5
    w1 = jax.random.uniform(k_w1, (F, H), jnp.float32, -lim1, lim1)
    b1 = jnp.zeros((H,), dtype=jnp.float32)
    w2 = jax.random.uniform(k_w2, (H, C), jnp.float32, -lim2, lim2)
    b2 = jnp.zeros((C,), dtype=jnp.float32)

    logits, hidden = gcn_forward(x, edge_index, edge_weight, w1, b1, w2, b2)
    jax.block_until_ready((logits, hidden))

    # Pure-JAX f32 dense reference; loose tolerance for the bf16 MXU path.
    loop_idx = jnp.arange(N, dtype=jnp.int32)
    ei = jnp.concatenate([edge_index, jnp.stack([loop_idx, loop_idx])], axis=1)
    ew = jnp.concatenate([edge_weight, jnp.ones((N,), jnp.float32)])
    row, col = ei[0], ei[1]
    deg = jnp.zeros((N,), jnp.float32).at[col].add(ew)
    dis = jnp.where(deg > 0, deg ** -0.5, 0.0)
    nrm = dis[row] * ew * dis[col]
    A_ref = jnp.zeros((N, N), jnp.float32).at[col, row].add(nrm)
    ref_hidden = jnp.maximum(A_ref @ (x @ w1) + b1, 0.0)
    ref_logits = A_ref @ (ref_hidden @ w2) + b2

    assert logits.shape == (N, C) and hidden.shape == (N, H)
    assert jnp.all(jnp.isfinite(logits)) and jnp.all(hidden >= 0.0)
    assert jnp.allclose(hidden, ref_hidden, rtol=1e-1, atol=1e-1)
    assert jnp.allclose(logits, ref_logits, rtol=1e-1, atol=1e-1)
    print("KERNEL_OK")
</pallas_src>

<mosaic_0001>
module attributes {stable_mosaic.version = 11 : i64} {
  func.func @kernel(%arg0: i32, %arg1: i32, %arg2: memref<256x256xbf16, #tpu.memory_space<vmem>>, %arg3: memref<256x128xbf16, #tpu.memory_space<vmem>>, %arg4: memref<1x128xf32, #tpu.memory_space<vmem>>, %arg5: memref<128x128xbf16, #tpu.memory_space<vmem>>, %arg6: memref<256x128xf32, #tpu.memory_space<vmem>>, %arg7: memref<256x128xbf16, #tpu.memory_space<vmem>>) attributes {dimension_semantics = [#tpu.dimension_semantics<parallel>, #tpu.dimension_semantics<arbitrary>], iteration_bounds = array<i64: 1, 1>, scalar_prefetch = 0 : i64, scratch_operands = 0 : i64, tpu.core_type = #tpu.core_type<tc>, window_params = [{transform_indices = @transform_0, window_bounds = array<i64: 256, 256>}, {pipeline_mode = #tpu.pipeline_mode<synchronous>, transform_indices = @transform_1, window_bounds = array<i64: 256, 128>}, {pipeline_mode = #tpu.pipeline_mode<synchronous>, transform_indices = @transform_2, window_bounds = array<i64: 1, 128>}, {pipeline_mode = #tpu.pipeline_mode<synchronous>, transform_indices = @transform_3, window_bounds = array<i64: 128, 128>}, {transform_indices = @transform_4, window_bounds = array<i64: 256, 128>}, {transform_indices = @transform_5, window_bounds = array<i64: 256, 128>}]} {
    %c0_i32 = arith.constant 0 : i32
    %0 = arith.cmpi eq, %arg1, %c0_i32 : i32
    %1 = arith.extui %0 : i1 to i32
    %c0_i32_0 = arith.constant 0 : i32
    %2 = arith.cmpi ne, %1, %c0_i32_0 : i32
    scf.if %2 {
      %cst_9 = arith.constant 0.000000e+00 : f32
      %15 = vector.broadcast %cst_9 : f32 to vector<256x128xf32>
      %c0_10 = arith.constant 0 : index
      %c0_11 = arith.constant 0 : index
      %16 = vector.load %arg6[%c0_10, %c0_11] : memref<256x128xf32, #tpu.memory_space<vmem>>, vector<256x128xf32>
      tpu.vector_store %arg6[%c0_10, %c0_11], %15 {strides = array<i32>} : memref<256x128xf32, #tpu.memory_space<vmem>>, vector<256x128xf32>,
    } else {
    }
    %c256_i32 = arith.constant 256 : i32
    %3 = arith.muli %arg1, %c256_i32 : i32
    %4 = tpu.assume_multiple %3, 256 : i32
    %c0 = arith.constant 0 : index
    %c0_1 = arith.constant 0 : index
    %5 = vector.load %arg6[%c0, %c0_1] : memref<256x128xf32, #tpu.memory_space<vmem>>, vector<256x128xf32>
    %c0_2 = arith.constant 0 : index
    %c0_3 = arith.constant 0 : index
    %6 = vector.load %arg2[%c0_2, %c0_3] : memref<256x256xbf16, #tpu.memory_space<vmem>>, vector<256x256xbf16>
    %7 = arith.index_cast %4 : i32 to index
    %c0_4 = arith.constant 0 : index
    %8 = vector.load %arg3[%7, %c0_4] : memref<256x128xbf16, #tpu.memory_space<vmem>>, vector<256x128xbf16>
    %cst = arith.constant dense<0.000000e+00> : vector<256x128xf32>
    %9 = tpu.matmul %6, %8, %cst {dimension_numbers = #tpu.dot_dimension_numbers<[1], [0], [0], [1], [0, 0, 1, 1], [], []>} : vector<256x256xbf16>, vector<256x128xbf16>, vector<256x128xf32> -> vector<256x128xf32>
    %10 = arith.addf %5, %9 : vector<256x128xf32>
    %c0_5 = arith.constant 0 : index
    %c0_6 = arith.constant 0 : index
    %11 = vector.load %arg6[%c0_5, %c0_6] : memref<256x128xf32, #tpu.memory_space<vmem>>, vector<256x128xf32>
    tpu.vector_store %arg6[%c0_5, %c0_6], %10 {strides = array<i32>} : memref<256x128xf32, #tpu.memory_space<vmem>>, vector<256x128xf32>,
    %c0_i32_7 = arith.constant 0 : i32
    %12 = arith.cmpi eq, %arg1, %c0_i32_7 : i32
    %13 = arith.extui %12 : i1 to i32
    %c0_i32_8 = arith.constant 0 : i32
    %14 = arith.cmpi ne, %13, %c0_i32_8 : i32
    scf.if %14 {
      %c0_9 = arith.constant 0 : index
      %c0_10 = arith.constant 0 : index
      %15 = vector.load %arg6[%c0_9, %c0_10] : memref<256x128xf32, #tpu.memory_space<vmem>>, vector<256x128xf32>
      %c0_11 = arith.constant 0 : index
      %c0_12 = arith.constant 0 : index
      %16 = vector.load %arg4[%c0_11, %c0_12] : memref<1x128xf32, #tpu.memory_space<vmem>>, vector<1x128xf32>
      %17 = vector.broadcast %16 : vector<1x128xf32> to vector<256x128xf32>
      %18 = arith.addf %15, %17 : vector<256x128xf32>
      %cst_13 = arith.constant 0.000000e+00 : f32
      %19 = vector.broadcast %cst_13 : f32 to vector<256x128xf32>
      %20 = arith.maximumf %18, %19 : vector<256x128xf32>
      %c0_14 = arith.constant 0 : index
      %c0_15 = arith.constant 0 : index
      %21 = vector.load %arg6[%c0_14, %c0_15] : memref<256x128xf32, #tpu.memory_space<vmem>>, vector<256x128xf32>
      tpu.vector_store %arg6[%c0_14, %c0_15], %20 {strides = array<i32>} : memref<256x128xf32, #tpu.memory_space<vmem>>, vector<256x128xf32>,
      %22 = arith.truncf %20 : vector<256x128xf32> to vector<256x128xbf16>
      %c0_16 = arith.constant 0 : index
      %c0_17 = arith.constant 0 : index
      %23 = vector.load %arg5[%c0_16, %c0_17] : memref<128x128xbf16, #tpu.memory_space<vmem>>, vector<128x128xbf16>
      %cst_18 = arith.constant dense<0.000000e+00> : vector<256x128xf32>
      %24 = tpu.matmul %22, %23, %cst_18 {dimension_numbers = #tpu.dot_dimension_numbers<[1], [0], [0], [1], [0, 0, 1, 1], [], []>} : vector<256x128xbf16>, vector<128x128xbf16>, vector<256x128xf32> -> vector<256x128xf32>
      %25 = arith.truncf %24 : vector<256x128xf32> to vector<256x128xbf16>
      %c0_19 = arith.constant 0 : index
      %c0_20 = arith.constant 0 : index
      %26 = vector.load %arg7[%c0_19, %c0_20] : memref<256x128xbf16, #tpu.memory_space<vmem>>, vector<256x128xbf16>
      tpu.vector_store %arg7[%c0_19, %c0_20], %25 {strides = array<i32>} : memref<256x128xbf16, #tpu.memory_space<vmem>>, vector<256x128xbf16>,
    } else {
    }
    return
  }
  func.func @transform_0(%arg0: i32, %arg1: i32) -> (i32, i32) {
    %c0_i32 = arith.constant 0 : i32
    return %arg0, %arg1 : i32, i32
  }
  func.func @transform_1(%arg0: i32, %arg1: i32) -> (i32, i32) {
    %c0_i32 = arith.constant 0 : i32
    %c0_i32_0 = arith.constant 0 : i32
    %c0_i32_1 = arith.constant 0 : i32
    return %c0_i32, %c0_i32_0 : i32, i32
  }
  func.func @transform_2(%arg0: i32, %arg1: i32) -> (i32, i32) {
    %c0_i32 = arith.constant 0 : i32
    %c0_i32_0 = arith.constant 0 : i32
    %c0_i32_1 = arith.constant 0 : i32
    return %c0_i32, %c0_i32_0 : i32, i32
  }
  func.func @transform_3(%arg0: i32, %arg1: i32) -> (i32, i32) {
    %c0_i32 = arith.constant 0 : i32
    %c0_i32_0 = arith.constant 0 : i32
    %c0_i32_1 = arith.constant 0 : i32
    return %c0_i32, %c0_i32_0 : i32, i32
  }
  func.func @transform_4(%arg0: i32, %arg1: i32) -> (i32, i32) {
    %c0_i32 = arith.constant 0 : i32
    %c0_i32_0 = arith.constant 0 : i32
    return %arg0, %c0_i32 : i32, i32
  }
  func.func @transform_5(%arg0: i32, %arg1: i32) -> (i32, i32) {
    %c0_i32 = arith.constant 0 : i32
    %c0_i32_0 = arith.constant 0 : i32
    return %arg0, %c0_i32 : i32, i32
  }
}

</mosaic_0001>

<bundles_post_ra>
// kernel: tpu_custom_call.1
= control target key start
LH: loop header
LB: loop body
LE: loop exit
PB: predicated region body
PF: predicated region fallthrough
CT: control target
= control target key end

     0   :  { %11 = vsyncpa [#allocation3], 0  ;;  %s1779_s0 = inlined_call_operand.hbm [shape: bf16[256,256], index: 0, kind: input, shape index: {}]   ;;  %s1780_s1 = inlined_call_operand.hbm [shape: bf16[256,128], index: 1, kind: input, shape index: {}]   ;;  %s1781_s2 = inlined_call_operand.vmem [shape: f32[1,128], index: 2, kind: input, shape index: {}]   ;;  %s1782_s3 = inlined_call_operand.hbm [shape: bf16[128,128], index: 3, kind: input, shape index: {}]   ;;  %s1783_s4 = inlined_call_operand.hbm [shape: f32[256,128], index: 4, kind: output, shape index: {0}]   ;;  %s1784_s5 = inlined_call_operand.hbm [shape: bf16[256,128], index: 5, kind: output, shape index: {1}]  }
   0x1   :  { %12 = vsyncpa [#allocation6], 0 }
   0x2   :  { %13 = vsyncpa [#allocation4], 0  ;;  %s32_s20 = sshll.u32 %s1780_s1, 4  ;;  %s33_s20 = int_to_ptr.hbm [resolvable:$true] %s32_s20 }
   0x3   :  { %14 = vsyncpa [#allocation10], 0  ;;  %s1649_s21 = smov [#allocation5]   ;;  %s19_s25 = sshll.u32 %s1779_s0, 4  ;;  %s20_s25 = int_to_ptr.hbm [resolvable:$true] %s19_s25 }
   0x4   :  { %s34_s22 = sshll.u32 %s1649_s21, 4  ;;  %s1650_s26 = smov 64   ;;  %s35_s22 = int_to_ptr.vmem [resolvable:$true] %s34_s22 }
   0x5   :  { %s1651_s27 = smov 4   ;;  %s1652_s28 = smov [#allocation2]  }
   0x6   :  { %40 = dma.hbm_to_vmem [thread:$0]  %s33_s20, 2048, %s35_s22, [#allocation6], %s1650_s26, %s1650_s26, %s1651_s27  }
   0x7   :  { %s21_s29 = sshll.u32 %s1652_s28, 4  ;;  %s1653_s1 = smov 128   ;;  %s22_s29 = int_to_ptr.vmem [resolvable:$true] %s21_s29 }
   0x8   :  { %s1654_s30 = smov 8   ;;  %s47_s0 = sshll.u32 %s1782_s3, 4  ;;  %s48_s0 = int_to_ptr.hbm [resolvable:$true] %s47_s0 }
   0x9   :  { %27 = dma.hbm_to_vmem [thread:$0]  %s20_s25, 4096, %s22_s29, [#allocation3], %s1653_s1, %s1653_s1, %s1654_s30  }
   0xa   :  { %s1655_s8 = smov [#allocation7]  }
   0xb   :  { %s49_s9 = sshll.u32 %s1655_s8, 4  ;;  %s50_s9 = int_to_ptr.vmem [resolvable:$true] %s49_s9 }
   0xc   :  { %55 = dma.hbm_to_vmem [thread:$0]  %s48_s0, 1024, %s50_s9, [#allocation6], %s1650_s26, %s1650_s26, %s1651_s27  }
   0xd   :  { %1641 = dma.done.wait [#allocation3], 4096  }
   0xe   :  { %1642 = vsyncadd [#allocation3], 4294963200 }
   0xf   :  { %1643 = dma.done.wait [#allocation6], 3072  }
  0x10   :  { %1644 = vsyncadd [#allocation6], 4294964224  ;;  %v1374_v0 = vld [vmem:[#allocation5 + $0x38] sm:$0xff]  ;;  %v1373_v2 = vld [vmem:[#allocation5 + $0x30] sm:$0xff]  ;;  %s1077_s14 = sshll.u32 %s1783_s4, 4  ;;  %s1657_s4 = smov [#allocation9]   ;;  %s1078_s14 = int_to_ptr.hbm [resolvable:$true] %s1077_s14 }
  0x11   :  { %v1382_v1 = vld [vmem:[#allocation5 + $0x78] sm:$0xff]  ;;  %461 = vmatpush.bf16.msra.mxu0 %v1374_v0  ;;  %1486 = vmatpush.bf16.msra.mxu3 %v1374_v0  ;;  %v1381_v3 = vld [vmem:[#allocation5 + $0x70] sm:$0xff]  ;;  %v1372_v4 = vld [vmem:[#allocation5 + $0x28] sm:$0xff]  ;;  %s1088_s15 = sshll.u32 %s1657_s4, 4  ;;  %s1090_s18 = sshll.u32 %s1784_s5, 4  ;;  %s1089_s15 = int_to_ptr.vmem [resolvable:$true] %s1088_s15  ;;  %s1091_s18 = int_to_ptr.hbm [resolvable:$true] %s1090_s18 }
  0x12   :  { %550 = vmatpush.bf16.msra.mxu1 %v1382_v1  ;;  %v1380_v5 = vld [vmem:[#allocation5 + $0x68] sm:$0xff]  ;;  %v1371_v6 = vld [vmem:[#allocation5 + $0x20] sm:$0xff]  ;;  %v1370_v8 = vld [vmem:[#allocation5 + $0x18] sm:$0xff] }
  0x13   :  { %v1379_v7 = vld [vmem:[#allocation5 + $0x60] sm:$0xff]  ;;  %v1378_v9 = vld [vmem:[#allocation5 + $0x58] sm:$0xff]  ;;  %v1369_v10 = vld [vmem:[#allocation5 + $0x10] sm:$0xff] }
  0x14   :  { %v1377_v11 = vld [vmem:[#allocation5 + $0x50] sm:$0xff]  ;;  %v1368_v12 = vld [vmem:[#allocation5 + $0x8] sm:$0xff]  ;;  %v1367_v14 = vld [vmem:[#allocation5] sm:$0xff] }
  0x15   :  { %462 = vmatpush.bf16.msra.mxu0 %v1373_v2  ;;  %1487 = vmatpush.bf16.msra.mxu3 %v1373_v2  ;;  %v1376_v13 = vld [vmem:[#allocation5 + $0x48] sm:$0xff]  ;;  %v1113_v15 = vld [vmem:[#allocation2] sm:$0xf]  ;;  %v1335_v20 = vld [vmem:[#allocation2 + $0x4] sm:$0xf] }
  0x16   :  { %551 = vmatpush.bf16.msra.mxu1 %v1381_v3  ;;  %v1336_v16 = vld [vmem:[#allocation2 + $0x4] sm:$0xf0]  ;;  %v1209_v17 = vld [vmem:[#allocation2 + $0xc0] sm:$0xf]  ;;  %v1115_v21 = vld [vmem:[#allocation2 + $0x8] sm:$0xf0] }
  0x17   :  { %v1360_v18 = vld [vmem:[#allocation2 + $0xc4] sm:$0xf0]  ;;  %v1375_v19 = vld [vmem:[#allocation5 + $0x40] sm:$0xff]  ;;  %v1114_v22 = vor.u32 %v1336_v16, %v1113_v15  ;;  %v1118_v24 = vor.u32 %v1335_v20, %v1115_v21  ;;  %v1121_v25 = vld [vmem:[#allocation2 + $0x10] sm:$0xf] }
  0x18   :  { %v1210_v23 = vor.u32 %v1360_v18, %v1209_v17  ;;  %v1338_v26 = vld [vmem:[#allocation2 + $0x14] sm:$0xf0]  ;;  %v1217_v27 = vld [vmem:[#allocation2 + $0xd0] sm:$0xf]  ;;  %v1337_v29 = vld [vmem:[#allocation2 + $0x14] sm:$0xf] }
  0x19   :  { %463 = vmatpush.bf16.msra.mxu0 %v1372_v4  ;;  %1488 = vmatpush.bf16.msra.mxu3 %v1372_v4  ;;  %v1362_v28 = vld [vmem:[#allocation2 + $0xd4] sm:$0xf0]  ;;  %v1123_v30 = vld [vmem:[#allocation2 + $0x18] sm:$0xf0]  ;;  %v1122_v31 = vor.u32 %v1338_v26, %v1121_v25  ;;  %v1129_v34 = vld [vmem:[#allocation2 + $0x20] sm:$0xf] }
  0x1a   :  { %552 = vmatpush.bf16.msra.mxu1 %v1380_v5  ;;  %v1218_v32 = vor.u32 %v1362_v28, %v1217_v27  ;;  %v1126_v33 = vor.u32 %v1337_v29, %v1123_v30  ;;  %v1340_v35 = vld [vmem:[#allocation2 + $0x24] sm:$0xf0]  ;;  %v1225_v36 = vld [vmem:[#allocation2 + $0xe0] sm:$0xf]  ;;  %v1339_v38 = vld [vmem:[#allocation2 + $0x24] sm:$0xf] }
  0x1b   :  { %v1364_v37 = vld [vmem:[#allocation2 + $0xe4] sm:$0xf0]  ;;  %v1131_v39 = vld [vmem:[#allocation2 + $0x28] sm:$0xf0]  ;;  %v1130_v40 = vor.u32 %v1340_v35, %v1129_v34  ;;  %v1137_v43 = vld [vmem:[#allocation2 + $0x30] sm:$0xf] }
  0x1c   :  { %v1226_v41 = vor.u32 %v1364_v37, %v1225_v36  ;;  %v1134_v42 = vor.u32 %v1339_v38, %v1131_v39  ;;  %v1342_v44 = vld [vmem:[#allocation2 + $0x34] sm:$0xf0]  ;;  %v1233_v45 = vld [vmem:[#allocation2 + $0xf0] sm:$0xf]  ;;  %v1341_v47 = vld [vmem:[#allocation2 + $0x34] sm:$0xf] }
  0x1d   :  { %464 = vmatpush.bf16.msra.mxu0 %v1371_v6  ;;  %1489 = vmatpush.bf16.msra.mxu3 %v1371_v6  ;;  %v1366_v46 = vld [vmem:[#allocation2 + $0xf4] sm:$0xf0]  ;;  %v1139_v48 = vld [vmem:[#allocation2 + $0x38] sm:$0xf0]  ;;  %v1138_v49 = vor.u32 %v1342_v44, %v1137_v43  ;;  %v1145_v52 = vld [vmem:[#allocation2 + $0x40] sm:$0xf] }
  0x1e   :  { %553 = vmatpush.bf16.msra.mxu1 %v1379_v7  ;;  %v1234_v50 = vor.u32 %v1366_v46, %v1233_v45  ;;  %v1142_v51 = vor.u32 %v1341_v47, %v1139_v48  ;;  %v1344_v53 = vld [vmem:[#allocation2 + $0x44] sm:$0xf0]  ;;  %v1359_v54 = vld [vmem:[#allocation2 + $0xc4] sm:$0xf]  ;;  %v1211_v55 = vld [vmem:[#allocation2 + $0xc8] sm:$0xf0] }
  0x1f   :  { %v1343_v56 = vld [vmem:[#allocation2 + $0x44] sm:$0xf]  ;;  %v1147_v57 = vld [vmem:[#allocation2 + $0x48] sm:$0xf0]  ;;  %v1146_v58 = vor.u32 %v1344_v53, %v1145_v52  ;;  %v1214_v59 = vor.u32 %v1359_v54, %v1211_v55  ;;  %v1153_v61 = vld [vmem:[#allocation2 + $0x50] sm:$0xf] }
  0x20   :  { %v1150_v60 = vor.u32 %v1343_v56, %v1147_v57  ;;  %v1346_v62 = vld [vmem:[#allocation2 + $0x54] sm:$0xf0]  ;;  %v1361_v63 = vld [vmem:[#allocation2 + $0xd4] sm:$0xf]  ;;  %v1219_v0 = vld [vmem:[#allocation2 + $0xd8] sm:$0xf0] }
  0x21   :  { %465 = vmatpush.bf16.msra.mxu0 %v1370_v8  ;;  %1490 = vmatpush.bf16.msra.mxu3 %v1370_v8  ;;  %v1155_v2 = vld [vmem:[#allocation2 + $0x58] sm:$0xf0]  ;;  %v1222_v4 = vor.u32 %v1361_v63, %v1219_v0  ;;  %v1161_v8 = vld [vmem:[#allocation2 + $0x60] sm:$0xf]  ;;  %v1385_v20 = vld [vmem:[#allocation7 + $0x10] sm:$0xff] }
  0x22   :  { %554 = vmatpush.bf16.msra.mxu1 %v1378_v9  ;;  %v1390_v6 = vld [vmem:[#allocation7 + $0x38] sm:$0xff]  ;;  %v1387_v17 = vld [vmem:[#allocation7 + $0x20] sm:$0xff]  ;;  %v1169_v21 = vld [vmem:[#allocation2 + $0x70] sm:$0xf] }
  0x23   :  { %918 = vmatpush.bf16.msra.mxu2 %v1390_v6  ;;  %v1235_v25 = vld [vmem:[#allocation2 + $0xf8] sm:$0xf0]  ;;  %v1349_v26 = vld [vmem:[#allocation2 + $0x74] sm:$0xf]  ;;  %v1383_v30 = vld [vmem:[#allocation7] sm:$0xff] }
  0x24   :  { %v1171_v27 = vld [vmem:[#allocation2 + $0x78] sm:$0xf0]  ;;  %v1351_v34 = vld [vmem:[#allocation2 + $0x84] sm:$0xf]  ;;  %v1179_v35 = vld [vmem:[#allocation2 + $0x88] sm:$0xf0] }
  0x25   :  { %466 = vmatpush.bf16.msra.mxu0 %v1369_v10  ;;  %1491 = vmatpush.bf16.msra.mxu3 %v1369_v10  ;;  %v1348_v10 = vld [vmem:[#allocation2 + $0x64] sm:$0xf0]  ;;  %v1182_v38 = vor.u32 %v1351_v34, %v1179_v35  ;;  %v1185_v48 = vld [vmem:[#allocation2 + $0x90] sm:$0xf] }
  0x26   :  { %555 = vmatpush.bf16.msra.mxu1 %v1377_v11  ;;  %v1162_v15 = vor.u32 %v1348_v10, %v1161_v8 }
  0x29   :  { %467 = vmatpush.bf16.msra.mxu0 %v1368_v12  ;;  %1492 = vmatpush.bf16.msra.mxu3 %v1368_v12  ;;  %v1227_v12 = vld [vmem:[#allocation2 + $0xe8] sm:$0xf0] }
  0x2a   :  { %556 = vmatpush.bf16.msra.mxu1 %v1376_v13 }
  0x2d   :  { %468 = vmatpush.bf16.msra.mxu0 %v1367_v14  ;;  %1493 = vmatpush.bf16.msra.mxu3 %v1367_v14  ;;  %v1163_v14 = vld [vmem:[#allocation2 + $0x68] sm:$0xf0] }
  0x2e   :  { %557 = vmatpush.bf16.msra.mxu1 %v1375_v19 }
  0x30   :  { %469 = vmatmul.bf16.vlgmr.msra.gmra.mxu0 %v1114_v22  ;;  %529 = vmatmul.bf16.vlgmr.msra.gmra.mxu3 %v1210_v23  ;;  %v1384_v22 = vld [vmem:[#allocation7 + $0x8] sm:$0xff]  ;;  %v1350_v23 = vld [vmem:[#allocation2 + $0x74] sm:$0xf0] }
  0x31   :  { %1494 = vmatpush.bf16.msrb.mxu3 %v1382_v1  ;;  %558 = vmatmul.bf16.vlgmr.msra.gmra.mxu1 %v1118_v24  ;;  %v1345_v1 = vld [vmem:[#allocation2 + $0x54] sm:$0xf]  ;;  %v1170_v28 = vor.u32 %v1350_v23, %v1169_v21  ;;  %v1358_v23 = vld [vmem:[#allocation2 + $0xb4] sm:$0xf0] }
  0x32   :  { %v1365_v24 = vld [vmem:[#allocation2 + $0xf4] sm:$0xf] }
  0x33   :  { %v1238_v29 = vor.u32 %v1365_v24, %v1235_v25  ;;  %v1357_v24 = vld [vmem:[#allocation2 + $0xb4] sm:$0xf]  ;;  %v1203_v25 = vld [vmem:[#allocation2 + $0xb8] sm:$0xf0] }
  0x35   :  { %1495 = vmatpush.bf16.msrb.mxu3 %v1381_v3  ;;  %v1154_v3 = vor.u32 %v1346_v62, %v1153_v61 }
  0x39   :  { %1496 = vmatpush.bf16.msrb.mxu3 %v1380_v5  ;;  %v1158_v5 = vor.u32 %v1345_v1, %v1155_v2 }
  0x3d   :  { %1497 = vmatpush.bf16.msrb.mxu3 %v1379_v7  ;;  %v1389_v7 = vld [vmem:[#allocation7 + $0x30] sm:$0xff] }
  0x3e   :  { %919 = vmatpush.bf16.msra.mxu2 %v1389_v7 }
  0x40   :  { %474 = vmatmul.bf16.gmra.mxu0 %v1122_v31  ;;  %534 = vmatmul.bf16.gmra.mxu3 %v1218_v32  ;;  %v1174_v31 = vor.u32 %v1349_v26, %v1171_v27  ;;  %v1177_v32 = vld [vmem:[#allocation2 + $0x80] sm:$0xf] }
  0x41   :  { %1498 = vmatpush.bf16.msrb.mxu3 %v1378_v9  ;;  %563 = vmatmul.bf16.gmra.mxu1 %v1126_v33  ;;  %v1388_v9 = vld [vmem:[#allocation7 + $0x28] sm:$0xff] }
  0x42   :  { %920 = vmatpush.bf16.msra.mxu2 %v1388_v9  ;;  %v1352_v33 = vld [vmem:[#allocation2 + $0x84] sm:$0xf0] }
  0x43   :  { %v1178_v36 = vor.u32 %v1352_v33, %v1177_v32 }
  0x45   :  { %1499 = vmatpush.bf16.msrb.mxu3 %v1377_v11  ;;  %v1363_v11 = vld [vmem:[#allocation2 + $0xe4] sm:$0xf] }
  0x46   :  { %v1230_v16 = vor.u32 %v1363_v11, %v1227_v12  ;;  %921 = vmatpush.bf16.msra.mxu2 %v1387_v17 }
  0x49   :  { %1500 = vmatpush.bf16.msrb.mxu3 %v1376_v13  ;;  %v1347_v13 = vld [vmem:[#allocation2 + $0x64] sm:$0xf] }
  0x4a   :  { %v1166_v18 = vor.u32 %v1347_v13, %v1163_v14 }
  0x4d   :  { %1501 = vmatpush.bf16.msrb.mxu3 %v1375_v19  ;;  %v1386_v19 = vld [vmem:[#allocation7 + $0x18] sm:$0xff] }
  0x4e   :  { %922 = vmatpush.bf16.msra.mxu2 %v1386_v19 }
  0x50   :  { %479 = vmatmul.bf16.gmra.mxu0 %v1130_v40  ;;  %539 = vmatmul.bf16.gmra.mxu3 %v1226_v41  ;;  %v1709_v41 = vld [vmem:[%s1781_s2] ss:$0 sm:$0xff]  ;;  %s1656_s2 = smov [#allocation8]  }
  0x51   :  { %568 = vmatmul.bf16.gmra.mxu1 %v1134_v42  ;;  %1502 = vmatpush.bf16.msra.mxu3 %v1390_v6  ;;  %v1195_v6 = vld [vmem:[#allocation2 + $0xa8] sm:$0xf0]  ;;  %s1075_s11 = sshll.u32 %s1656_s2, 4  ;;  %s1076_s11 = int_to_ptr.vmem [resolvable:$true] %s1075_s11 }
  0x52   :  { %923 = vmatpush.bf16.msra.mxu2 %v1385_v20 }
  0x55   :  { %1503 = vmatpush.bf16.msra.mxu3 %v1389_v7 }
  0x56   :  { %924 = vmatpush.bf16.msra.mxu2 %v1384_v22 }
  0x59   :  { %1504 = vmatpush.bf16.msra.mxu3 %v1388_v9 }
  0x5a   :  { %925 = vmatpush.bf16.msra.mxu2 %v1383_v30 }
  0x5d   :  { %1505 = vmatpush.bf16.msra.mxu3 %v1387_v17 }
  0x60   :  { %484 = vmatmul.bf16.gmra.mxu0 %v1138_v49  ;;  %544 = vmatmul.bf16.gmra.mxu3 %v1234_v50  ;;  %v1354_v49 = vld [vmem:[#allocation2 + $0x94] sm:$0xf0]  ;;  %v1353_v50 = vld [vmem:[#allocation2 + $0x94] sm:$0xf] }
  0x61   :  { %573 = vmatmul.bf16.gmra.mxu1 %v1142_v51  ;;  %1506 = vmatpush.bf16.msra.mxu3 %v1386_v19  ;;  %v1187_v51 = vld [vmem:[#allocation2 + $0x98] sm:$0xf0]  ;;  %v1186_v54 = vor.u32 %v1354_v49, %v1185_v48 }
  0x62   :  { %v1190_v56 = vor.u32 %v1353_v50, %v1187_v51 }
  0x65   :  { %1507 = vmatpush.bf16.msra.mxu3 %v1385_v20 }
  0x69   :  { %1508 = vmatpush.bf16.msra.mxu3 %v1384_v22  ;;  %v1201_v22 = vld [vmem:[#allocation2 + $0xb0] sm:$0xf] }
  0x6d   :  { %1509 = vmatpush.bf16.msra.mxu3 %v1383_v30  ;;  %v1206_v30 = vor.u32 %v1357_v24, %v1203_v25 }
  0x70   :  { %489 = vmatmul.bf16.gmra.mxu0 %v1146_v58  ;;  %618 = vmatmul.bf16.vlgmr.msrb.gmra.mxu3 %v1214_v59 }
  0x71   :  { %578 = vmatmul.bf16.gmra.mxu1 %v1150_v60 }
  0x80   :  { %494 = vmatmul.bf16.gmra.mxu0 %v1154_v3  ;;  %623 = vmatmul.bf16.gmra.mxu3 %v1222_v4  ;;  %v1193_v3 = vld [vmem:[#allocation2 + $0xa0] sm:$0xf]  ;;  %v1356_v4 = vld [vmem:[#allocation2 + $0xa4] sm:$0xf0] }
  0x81   :  { %583 = vmatmul.bf16.gmra.mxu1 %v1158_v5  ;;  %v1355_v5 = vld [vmem:[#allocation2 + $0xa4] sm:$0xf]  ;;  %v1194_v9 = vor.u32 %v1356_v4, %v1193_v3 }
  0x82   :  { %v1198_v11 = vor.u32 %v1355_v5, %v1195_v6 }
  0x90   :  { %499 = vmatmul.bf16.gmra.mxu0 %v1162_v15  ;;  %628 = vmatmul.bf16.gmra.mxu3 %v1230_v16 }
  0x91   :  { %588 = vmatmul.bf16.gmra.mxu1 %v1166_v18 }
  0xa0   :  { %504 = vmatmul.bf16.gmra.mxu0 %v1170_v28  ;;  %633 = vmatmul.bf16.gmra.mxu3 %v1238_v29  ;;  %v1202_v28 = vor.u32 %v1358_v23, %v1201_v22 }
  0xa1   :  { %593 = vmatmul.bf16.gmra.mxu1 %v1174_v31 }
  0xad   :  { %v470_v37 = vpop.f32.mrf.mxu0 }
  0xae   :  { %v559_v39 = vpop.f32.mrf.mxu1 }
  0xaf   :  { %v560_v40 = vadd.f32 %v559_v39, %v470_v37 }
  0xb0   :  { %509 = vmatmul.bf16.gmra.mxu0 %v1178_v36 }
  0xb1   :  { %598 = vmatmul.bf16.gmra.mxu1 %v1182_v38  ;;  %v742_v43 = vadd.f32 %v1709_v41, %v560_v40 }
  0xb3   :  { %v1711_v42 = vpop.f32.mrf.mxu3  ;;  %v774_v45 = vmax.f32 %v742_v43, 0.0 }
  0xb5   :  { %v472_v44 = vpop.f32.mrf.mxu0  ;;  %806 = vst [vmem:[#allocation8] sm:$0xff] %v774_v45 }
  0xb6   :  { %v561_v46 = vpop.f32.mrf.mxu1 }
  0xb7   :  { %v562_v47 = vadd.f32 %v561_v46, %v472_v44 }
  0xb9   :  { %v743_v53 = vadd.f32 %v1709_v41, %v562_v47 }
  0xbb   :  { %v1714_v52 = vpop.f32.mrf.mxu3  ;;  %v775_v57 = vmax.f32 %v743_v53, 0.0 }
  0xbd   :  { %v475_v55 = vpop.f32.mrf.mxu0  ;;  %807 = vst [vmem:[#allocation8 + $0x8] sm:$0xff] %v775_v57  ;;  %v838_v60 = vpack.c.bf16 %v775_v57, %v774_v45 }
  0xbe   :  { %v564_v58 = vpop.f32.mrf.mxu1 }
  0xbf   :  { %v565_v59 = vadd.f32 %v564_v58, %v475_v55  ;;  %926 = vmatmul.bf16.vlgmr.msra.gmra.mxu2 %v838_v60 }
  0xc0   :  { %514 = vmatmul.bf16.gmra.mxu0 %v1186_v54 }
  0xc1   :  { %603 = vmatmul.bf16.gmra.mxu1 %v1190_v56  ;;  %v744_v62 = vadd.f32 %v1709_v41, %v565_v59 }
  0xc3   :  { %v1717_v61 = vpop.f32.mrf.mxu3  ;;  %v776_v0 = vmax.f32 %v744_v62, 0.0 }
  0xc5   :  { %v477_v63 = vpop.f32.mrf.mxu0  ;;  %808 = vst [vmem:[#allocation8 + $0x10] sm:$0xff] %v776_v0 }
  0xc6   :  { %v566_v1 = vpop.f32.mrf.mxu1 }
  0xc7   :  { %v567_v2 = vadd.f32 %v566_v1, %v477_v63 }
  0xc9   :  { %v745_v8 = vadd.f32 %v1709_v41, %v567_v2 }
  0xcb   :  { %v1720_v7 = vpop.f32.mrf.mxu3  ;;  %v777_v12 = vmax.f32 %v745_v8, 0.0 }
  0xcd   :  { %v480_v10 = vpop.f32.mrf.mxu0  ;;  %809 = vst [vmem:[#allocation8 + $0x18] sm:$0xff] %v777_v12  ;;  %v839_v15 = vpack.c.bf16 %v777_v12, %v776_v0 }
  0xce   :  { %v569_v13 = vpop.f32.mrf.mxu1 }
  0xcf   :  { %v570_v14 = vadd.f32 %v569_v13, %v480_v10  ;;  %931 = vmatmul.bf16.gmra.mxu2 %v839_v15 }
  0xd0   :  { %519 = vmatmul.bf16.gmra.mxu0 %v1194_v9 }
  0xd1   :  { %608 = vmatmul.bf16.gmra.mxu1 %v1198_v11  ;;  %v746_v17 = vadd.f32 %v1709_v41, %v570_v14 }
  0xd3   :  { %v1723_v16 = vpop.f32.mrf.mxu3  ;;  %v778_v19 = vmax.f32 %v746_v17, 0.0 }
  0xd5   :  { %v482_v18 = vpop.f32.mrf.mxu0  ;;  %810 = vst [vmem:[#allocation8 + $0x20] sm:$0xff] %v778_v19 }
  0xd6   :  { %v571_v20 = vpop.f32.mrf.mxu1 }
  0xd7   :  { %v572_v21 = vadd.f32 %v571_v20, %v482_v18 }
  0xd9   :  { %v747_v27 = vadd.f32 %v1709_v41, %v572_v21 }
  0xdb   :  { %v1726_v26 = vpop.f32.mrf.mxu3  ;;  %v779_v31 = vmax.f32 %v747_v27, 0.0 }
  0xdd   :  { %v485_v29 = vpop.f32.mrf.mxu0  ;;  %811 = vst [vmem:[#allocation8 + $0x28] sm:$0xff] %v779_v31  ;;  %v840_v34 = vpack.c.bf16 %v779_v31, %v778_v19 }
  0xde   :  { %v574_v32 = vpop.f32.mrf.mxu1 }
  0xdf   :  { %v575_v33 = vadd.f32 %v574_v32, %v485_v29  ;;  %936 = vmatmul.bf16.gmra.mxu2 %v840_v34 }
  0xe0   :  { %524 = vmatmul.bf16.gmra.mxu0 %v1202_v28 }
  0xe1   :  { %613 = vmatmul.bf16.gmra.mxu1 %v1206_v30  ;;  %v748_v36 = vadd.f32 %v1709_v41, %v575_v33 }
  0xe3   :  { %v1729_v35 = vpop.f32.mrf.mxu3  ;;  %v780_v38 = vmax.f32 %v748_v36, 0.0 }
  0xe5   :  { %v487_v37 = vpop.f32.mrf.mxu0  ;;  %812 = vst [vmem:[#allocation8 + $0x30] sm:$0xff] %v780_v38 }
  0xe6   :  { %v576_v39 = vpop.f32.mrf.mxu1 }
  0xe7   :  { %v577_v40 = vadd.f32 %v576_v39, %v487_v37 }
  0xe9   :  { %v749_v44 = vadd.f32 %v1709_v41, %v577_v40 }
  0xeb   :  { %v1732_v43 = vpop.f32.mrf.mxu3  ;;  %v781_v46 = vmax.f32 %v749_v44, 0.0 }
  0xed   :  { %v490_v45 = vpop.f32.mrf.mxu0  ;;  %813 = vst [vmem:[#allocation8 + $0x38] sm:$0xff] %v781_v46  ;;  %v841_v49 = vpack.c.bf16 %v781_v46, %v780_v38 }
  0xee   :  { %v579_v47 = vpop.f32.mrf.mxu1 }
  0xef   :  { %v580_v48 = vadd.f32 %v579_v47, %v490_v45  ;;  %941 = vmatmul.bf16.gmra.mxu2 %v841_v49 }
  0xf1   :  { %v750_v51 = vadd.f32 %v1709_v41, %v580_v48 }
  0xf3   :  { %v619_v50 = vpop.f32.mrf.mxu3  ;;  %v782_v55 = vmax.f32 %v750_v51, 0.0 }
  0xf4   :  { %v620_v53 = vadd.f32 %v619_v50, %v1711_v42 }
  0xf5   :  { %v492_v54 = vpop.f32.mrf.mxu0  ;;  %814 = vst [vmem:[#allocation8 + $0x40] sm:$0xff] %v782_v55 }
  0xf6   :  { %v581_v56 = vpop.f32.mrf.mxu1  ;;  %v766_v58 = vadd.f32 %v1709_v41, %v620_v53 }
  0xf7   :  { %v582_v57 = vadd.f32 %v581_v56, %v492_v54 }
  0xf8   :  { %v798_v59 = vmax.f32 %v766_v58, 0.0 }
  0xf9   :  { %v751_v62 = vadd.f32 %v1709_v41, %v582_v57 }
  0xfa   :  { %830 = vst [vmem:[#allocation8 + $0xc0] sm:$0xff] %v798_v59 }
  0xfb   :  { %v621_v60 = vpop.f32.mrf.mxu3  ;;  %v783_v1 = vmax.f32 %v751_v62, 0.0 }
  0xfc   :  { %v622_v63 = vadd.f32 %v621_v60, %v1714_v52 }
  0xfd   :  { %v495_v0 = vpop.f32.mrf.mxu0  ;;  %815 = vst [vmem:[#allocation8 + $0x48] sm:$0xff] %v783_v1  ;;  %v842_v42 = vpack.c.bf16 %v783_v1, %v782_v55 }
  0xfe   :  { %v584_v2 = vpop.f32.mrf.mxu1  ;;  %v767_v4 = vadd.f32 %v1709_v41, %v622_v63 }
  0xff   :  { %v585_v3 = vadd.f32 %v584_v2, %v495_v0  ;;  %946 = vmatmul.bf16.gmra.mxu2 %v842_v42 }
 0x100   :  { %v799_v5 = vmax.f32 %v767_v4, 0.0 }
 0x101   :  { %v752_v8 = vadd.f32 %v1709_v41, %v585_v3 }
 0x102   :  { %831 = vst [vmem:[#allocation8 + $0xc8] sm:$0xff] %v799_v5  ;;  %v850_v10 = vpack.c.bf16 %v799_v5, %v798_v59 }
 0x103   :  { %v624_v6 = vpop.f32.mrf.mxu3  ;;  %v784_v52 = vmax.f32 %v752_v8, 0.0 }
 0x104   :  { %v625_v9 = vadd.f32 %v624_v6, %v1717_v61  ;;  %986 = vmatmul.bf16.vlgmr.msra.gmra.mxu3 %v850_v10 }
 0x105   :  { %v497_v11 = vpop.f32.mrf.mxu0  ;;  %816 = vst [vmem:[#allocation8 + $0x50] sm:$0xff] %v784_v52 }
 0x106   :  { %v586_v12 = vpop.f32.mrf.mxu1  ;;  %v768_v14 = vadd.f32 %v1709_v41, %v625_v9 }
 0x107   :  { %v587_v13 = vadd.f32 %v586_v12, %v497_v11 }
 0x108   :  { %v800_v15 = vmax.f32 %v768_v14, 0.0 }
 0x109   :  { %v753_v18 = vadd.f32 %v1709_v41, %v587_v13 }
 0x10a   :  { %832 = vst [vmem:[#allocation8 + $0xd0] sm:$0xff] %v800_v15 }
 0x10b   :  { %v626_v17 = vpop.f32.mrf.mxu3  ;;  %v785_v21 = vmax.f32 %v753_v18, 0.0 }
 0x10c   :  { %v627_v19 = vadd.f32 %v626_v17, %v1720_v7 }
 0x10d   :  { %v500_v20 = vpop.f32.mrf.mxu0  ;;  %817 = vst [vmem:[#allocation8 + $0x58] sm:$0xff] %v785_v21  ;;  %v843_v23 = vpack.c.bf16 %v785_v21, %v784_v52 }
 0x10e   :  { %v589_v61 = vpop.f32.mrf.mxu1  ;;  %v769_v24 = vadd.f32 %v1709_v41, %v627_v19 }
 0x10f   :  { %v590_v22 = vadd.f32 %v589_v61, %v500_v20  ;;  %951 = vmatmul.bf16.gmra.mxu2 %v843_v23 }
 0x110   :  { %v801_v25 = vmax.f32 %v769_v24, 0.0 }
 0x111   :  { %v754_v28 = vadd.f32 %v1709_v41, %v590_v22 }
 0x112   :  { %833 = vst [vmem:[#allocation8 + $0xd8] sm:$0xff] %v801_v25  ;;  %v851_v30 = vpack.c.bf16 %v801_v25, %v800_v15 }
 0x113   :  { %v629_v27 = vpop.f32.mrf.mxu3  ;;  %v786_v7 = vmax.f32 %v754_v28, 0.0 }
 0x114   :  { %v630_v29 = vadd.f32 %v629_v27, %v1723_v16  ;;  %991 = vmatmul.bf16.gmra.mxu3 %v851_v30 }
 0x115   :  { %v502_v31 = vpop.f32.mrf.mxu0  ;;  %818 = vst [vmem:[#allocation8 + $0x60] sm:$0xff] %v786_v7 }
 0x116   :  { %v591_v32 = vpop.f32.mrf.mxu1  ;;  %v770_v34 = vadd.f32 %v1709_v41, %v630_v29 }
 0x117   :  { %v592_v33 = vadd.f32 %v591_v32, %v502_v31 }
 0x118   :  { %v802_v36 = vmax.f32 %v770_v34, 0.0 }
 0x119   :  { %v755_v38 = vadd.f32 %v1709_v41, %v592_v33 }
 0x11a   :  { %834 = vst [vmem:[#allocation8 + $0xe0] sm:$0xff] %v802_v36 }
 0x11b   :  { %v631_v37 = vpop.f32.mrf.mxu3  ;;  %v787_v44 = vmax.f32 %v755_v38, 0.0 }
 0x11c   :  { %v632_v39 = vadd.f32 %v631_v37, %v1726_v26 }
 0x11d   :  { %v505_v40 = vpop.f32.mrf.mxu0  ;;  %819 = vst [vmem:[#allocation8 + $0x68] sm:$0xff] %v787_v44  ;;  %v844_v46 = vpack.c.bf16 %v787_v44, %v786_v7 }
 0x11e   :  { %v594_v16 = vpop.f32.mrf.mxu1  ;;  %v771_v47 = vadd.f32 %v1709_v41, %v632_v39 }
 0x11f   :  { %v595_v45 = vadd.f32 %v594_v16, %v505_v40  ;;  %956 = vmatmul.bf16.gmra.mxu2 %v844_v46 }
 0x120   :  { %v803_v48 = vmax.f32 %v771_v47, 0.0 }
 0x121   :  { %v756_v50 = vadd.f32 %v1709_v41, %v595_v45 }
 0x122   :  { %835 = vst [vmem:[#allocation8 + $0xe8] sm:$0xff] %v803_v48  ;;  %v852_v53 = vpack.c.bf16 %v803_v48, %v802_v36 }
 0x123   :  { %v634_v49 = vpop.f32.mrf.mxu3  ;;  %v788_v26 = vmax.f32 %v756_v50, 0.0 }
 0x124   :  { %v635_v51 = vadd.f32 %v634_v49, %v1729_v35  ;;  %996 = vmatmul.bf16.gmra.mxu3 %v852_v53 }
 0x125   :  { %v507_v54 = vpop.f32.mrf.mxu0  ;;  %820 = vst [vmem:[#allocation8 + $0x70] sm:$0xff] %v788_v26 }
 0x126   :  { %v596_v55 = vpop.f32.mrf.mxu1  ;;  %v772_v57 = vadd.f32 %v1709_v41, %v635_v51 }
 0x127   :  { %v597_v56 = vadd.f32 %v596_v55, %v507_v54 }
 0x128   :  { %v804_v58 = vmax.f32 %v772_v57, 0.0 }
 0x129   :  { %v757_v60 = vadd.f32 %v1709_v41, %v597_v56 }
 0x12a   :  { %836 = vst [vmem:[#allocation8 + $0xf0] sm:$0xff] %v804_v58 }
 0x12b   :  { %v636_v59 = vpop.f32.mrf.mxu3  ;;  %v789_v0 = vmax.f32 %v757_v60, 0.0 }
 0x12c   :  { %v637_v62 = vadd.f32 %v636_v59, %v1732_v43 }
 0x12d   :  { %v510_v63 = vpop.f32.mrf.mxu0  ;;  %821 = vst [vmem:[#allocation8 + $0x78] sm:$0xff] %v789_v0  ;;  %v845_v2 = vpack.c.bf16 %v789_v0, %v788_v26 }
 0x12e   :  { %v599_v35 = vpop.f32.mrf.mxu1  ;;  %v773_v3 = vadd.f32 %v1709_v41, %v637_v62 }
 0x12f   :  { %v600_v1 = vadd.f32 %v599_v35, %v510_v63  ;;  %961 = vmatmul.bf16.gmra.mxu2 %v845_v2 }
 0x130   :  { %v805_v42 = vmax.f32 %v773_v3, 0.0 }
 0x131   :  { %v758_v4 = vadd.f32 %v1709_v41, %v600_v1 }
 0x132   :  { %837 = vst [vmem:[#allocation8 + $0xf8] sm:$0xff] %v805_v42  ;;  %v853_v5 = vpack.c.bf16 %v805_v42, %v804_v58 }
 0x133   :  { %v790_v8 = vmax.f32 %v758_v4, 0.0 }
 0x134   :  { %1001 = vmatmul.bf16.gmra.mxu3 %v853_v5 }
 0x135   :  { %v512_v6 = vpop.f32.mrf.mxu0  ;;  %822 = vst [vmem:[#allocation8 + $0x80] sm:$0xff] %v790_v8 }
 0x136   :  { %v601_v9 = vpop.f32.mrf.mxu1 }
 0x137   :  { %v602_v43 = vadd.f32 %v601_v9, %v512_v6 }
 0x139   :  { %v759_v10 = vadd.f32 %v1709_v41, %v602_v43 }
 0x13b   :  { %v791_v52 = vmax.f32 %v759_v10, 0.0 }
 0x13d   :  { %v515_v11 = vpop.f32.mrf.mxu0  ;;  %823 = vst [vmem:[#allocation8 + $0x88] sm:$0xff] %v791_v52  ;;  %v846_v14 = vpack.c.bf16 %v791_v52, %v790_v8 }
 0x13e   :  { %v604_v12 = vpop.f32.mrf.mxu1 }
 0x13f   :  { %v605_v13 = vadd.f32 %v604_v12, %v515_v11  ;;  %966 = vmatmul.bf16.gmra.mxu2 %v846_v14 }
 0x141   :  { %v760_v15 = vadd.f32 %v1709_v41, %v605_v13 }
 0x142   :  { %v927_v17 = vpop.f32.mrf.mxu2 }
 0x143   :  { %v792_v19 = vmax.f32 %v760_v15, 0.0 }
 0x145   :  { %v517_v18 = vpop.f32.mrf.mxu0  ;;  %824 = vst [vmem:[#allocation8 + $0x90] sm:$0xff] %v792_v19 }
 0x146   :  { %v606_v20 = vpop.f32.mrf.mxu1 }
 0x147   :  { %v607_v21 = vadd.f32 %v606_v20, %v517_v18 }
 0x149   :  { %v761_v61 = vadd.f32 %v1709_v41, %v607_v21 }
 0x14a   :  { %v929_v22 = vpop.f32.mrf.mxu2 }
 0x14b   :  { %v1394_v24 = vpack.c.bf16 %v929_v22, %v927_v17  ;;  %v793_v25 = vmax.f32 %v761_v61, 0.0 }
 0x14d   :  { %v520_v23 = vpop.f32.mrf.mxu0  ;;  %1395 = vst [vmem:[#allocation9] sm:$0xff] %v1394_v24   ;;  %v847_v29 = vpack.c.bf16 %v793_v25, %v792_v19 }
 0x14e   :  { %v609_v27 = vpop.f32.mrf.mxu1  ;;  %825 = vst [vmem:[#allocation8 + $0x98] sm:$0xff] %v793_v25 }
 0x14f   :  { %v610_v28 = vadd.f32 %v609_v27, %v520_v23  ;;  %971 = vmatmul.bf16.gmra.mxu2 %v847_v29 }
 0x151   :  { %v762_v30 = vadd.f32 %v1709_v41, %v610_v28 }
 0x152   :  { %v932_v31 = vpop.f32.mrf.mxu2 }
 0x153   :  { %v794_v32 = vmax.f32 %v762_v30, 0.0 }
 0x155   :  { %v522_v7 = vpop.f32.mrf.mxu0  ;;  %826 = vst [vmem:[#allocation8 + $0xa0] sm:$0xff] %v794_v32 }
 0x156   :  { %v611_v33 = vpop.f32.mrf.mxu1 }
 0x157   :  { %v612_v34 = vadd.f32 %v611_v33, %v522_v7 }
 0x159   :  { %v763_v36 = vadd.f32 %v1709_v41, %v612_v34 }
 0x15a   :  { %v934_v37 = vpop.f32.mrf.mxu2 }
 0x15b   :  { %v1399_v39 = vpack.c.bf16 %v934_v37, %v932_v31  ;;  %v795_v40 = vmax.f32 %v763_v36, 0.0 }
 0x15d   :  { %v525_v38 = vpop.f32.mrf.mxu0  ;;  %1471 = vst [vmem:[#allocation9 + $0x8] sm:$0xff] %v1399_v39   ;;  %v848_v45 = vpack.c.bf16 %v795_v40, %v794_v32 }
 0x15e   :  { %v614_v44 = vpop.f32.mrf.mxu1  ;;  %827 = vst [vmem:[#allocation8 + $0xa8] sm:$0xff] %v795_v40 }
 0x15f   :  { %v615_v16 = vadd.f32 %v614_v44, %v525_v38  ;;  %976 = vmatmul.bf16.gmra.mxu2 %v848_v45 }
 0x161   :  { %v764_v46 = vadd.f32 %v1709_v41, %v615_v16 }
 0x162   :  { %v937_v47 = vpop.f32.mrf.mxu2 }
 0x163   :  { %v796_v49 = vmax.f32 %v764_v46, 0.0 }
 0x165   :  { %v527_v48 = vpop.f32.mrf.mxu0  ;;  %828 = vst [vmem:[#allocation8 + $0xb0] sm:$0xff] %v796_v49 }
 0x166   :  { %v616_v50 = vpop.f32.mrf.mxu1 }
 0x167   :  { %v617_v51 = vadd.f32 %v616_v50, %v527_v48 }
 0x169   :  { %v765_v53 = vadd.f32 %v1709_v41, %v617_v51 }
 0x16a   :  { %v939_v54 = vpop.f32.mrf.mxu2 }
 0x16b   :  { %v1404_v26 = vpack.c.bf16 %v939_v54, %v937_v47  ;;  %v797_v55 = vmax.f32 %v765_v53, 0.0 }
 0x16d   :  { %1472 = vst [vmem:[#allocation9 + $0x10] sm:$0xff] %v1404_v26   ;;  %v849_v56 = vpack.c.bf16 %v797_v55, %v796_v49 }
 0x16e   :  { %829 = vst [vmem:[#allocation8 + $0xb8] sm:$0xff] %v797_v55 }
 0x16f   :  { %981 = vmatmul.bf16.gmra.mxu2 %v849_v56  ;;  %1083 = dma.vmem_to_hbm [thread:$0]  %s1076_s11, 4096, %s1078_s14, [#allocation4], %s1653_s1, %s1653_s1, %s1654_s30  }
 0x172   :  { %v942_v57 = vpop.f32.mrf.mxu2 }
 0x17a   :  { %v944_v58 = vpop.f32.mrf.mxu2 }
 0x17b   :  { %v1409_v59 = vpack.c.bf16 %v944_v58, %v942_v57 }
 0x17d   :  { %1473 = vst [vmem:[#allocation9 + $0x18] sm:$0xff] %v1409_v59  }
 0x182   :  { %v947_v41 = vpop.f32.mrf.mxu2 }
 0x187   :  { %v987_v60 = vpop.f32.mrf.mxu3 }
 0x18a   :  { %v949_v62 = vpop.f32.mrf.mxu2 }
 0x18b   :  { %v1414_v63 = vpack.c.bf16 %v949_v62, %v947_v41 }
 0x18d   :  { %1474 = vst [vmem:[#allocation9 + $0x20] sm:$0xff] %v1414_v63  }
 0x18f   :  { %v989_v0 = vpop.f32.mrf.mxu3 }
 0x190   :  { %v1454_v35 = vpack.c.bf16 %v989_v0, %v987_v60 }
 0x192   :  { %1482 = vst [vmem:[#allocation9 + $0x60] sm:$0xff] %v1454_v35   ;;  %v952_v1 = vpop.f32.mrf.mxu2 }
 0x197   :  { %v992_v2 = vpop.f32.mrf.mxu3 }
 0x19a   :  { %v954_v3 = vpop.f32.mrf.mxu2 }
 0x19b   :  { %v1419_v42 = vpack.c.bf16 %v954_v3, %v952_v1 }
 0x19d   :  { %1475 = vst [vmem:[#allocation9 + $0x28] sm:$0xff] %v1419_v42  }
 0x19f   :  { %v994_v4 = vpop.f32.mrf.mxu3 }
 0x1a0   :  { %v1459_v5 = vpack.c.bf16 %v994_v4, %v992_v2 }
 0x1a2   :  { %1483 = vst [vmem:[#allocation9 + $0x68] sm:$0xff] %v1459_v5   ;;  %v957_v6 = vpop.f32.mrf.mxu2 }
 0x1a7   :  { %v997_v8 = vpop.f32.mrf.mxu3 }
 0x1aa   :  { %v959_v9 = vpop.f32.mrf.mxu2 }
 0x1ab   :  { %v1424_v43 = vpack.c.bf16 %v959_v9, %v957_v6 }
 0x1ad   :  { %1476 = vst [vmem:[#allocation9 + $0x30] sm:$0xff] %v1424_v43  }
 0x1af   :  { %v999_v10 = vpop.f32.mrf.mxu3 }
 0x1b0   :  { %v1464_v11 = vpack.c.bf16 %v999_v10, %v997_v8 }
 0x1b2   :  { %1484 = vst [vmem:[#allocation9 + $0x70] sm:$0xff] %v1464_v11   ;;  %v962_v52 = vpop.f32.mrf.mxu2 }
 0x1b7   :  { %v1002_v12 = vpop.f32.mrf.mxu3 }
 0x1ba   :  { %v964_v13 = vpop.f32.mrf.mxu2 }
 0x1bb   :  { %v1429_v14 = vpack.c.bf16 %v964_v13, %v962_v52 }
 0x1bd   :  { %1477 = vst [vmem:[#allocation9 + $0x38] sm:$0xff] %v1429_v14  }
 0x1bf   :  { %v1004_v15 = vpop.f32.mrf.mxu3 }
 0x1c0   :  { %v1469_v17 = vpack.c.bf16 %v1004_v15, %v1002_v12 }
 0x1c2   :  { %1485 = vst [vmem:[#allocation9 + $0x78] sm:$0xff] %v1469_v17   ;;  %v967_v18 = vpop.f32.mrf.mxu2 }
 0x1ca   :  { %v969_v19 = vpop.f32.mrf.mxu2 }
 0x1cb   :  { %v1434_v20 = vpack.c.bf16 %v969_v19, %v967_v18 }
 0x1cd   :  { %1478 = vst [vmem:[#allocation9 + $0x40] sm:$0xff] %v1434_v20  }
 0x1d2   :  { %v972_v21 = vpop.f32.mrf.mxu2 }
 0x1da   :  { %v974_v61 = vpop.f32.mrf.mxu2 }
 0x1db   :  { %v1439_v22 = vpack.c.bf16 %v974_v61, %v972_v21 }
 0x1dd   :  { %1479 = vst [vmem:[#allocation9 + $0x48] sm:$0xff] %v1439_v22  }
 0x1e2   :  { %v977_v23 = vpop.f32.mrf.mxu2 }
 0x1ea   :  { %v979_v24 = vpop.f32.mrf.mxu2 }
 0x1eb   :  { %v1444_v25 = vpack.c.bf16 %v979_v24, %v977_v23 }
 0x1ed   :  { %1480 = vst [vmem:[#allocation9 + $0x50] sm:$0xff] %v1444_v25  }
 0x1f2   :  { %v982_v27 = vpop.f32.mrf.mxu2 }
 0x1fa   :  { %v984_v28 = vpop.f32.mrf.mxu2 }
 0x1fb   :  { %v1449_v29 = vpack.c.bf16 %v984_v28, %v982_v27 }
 0x1fd   :  { %1481 = vst [vmem:[#allocation9 + $0x58] sm:$0xff] %v1449_v29  }
 0x1fe   :  { %1096 = dma.vmem_to_hbm [thread:$0]  %s1089_s15, 2048, %s1091_s18, [#allocation10], %s1650_s26, %s1650_s26, %s1651_s27  }
 0x1ff   :  { %1645 = dma.done.wait [#allocation4], 4096  }
 0x200   :  { %1646 = vsyncadd [#allocation4], 4294963200 }
 0x201   :  { %1647 = dma.done.wait [#allocation10], 2048  }
 0x202   :  { %1648 = vsyncadd [#allocation10], 4294965248 }
 0x203   :  { %1105 = vsyncpa [#allocation3], 1 }
 0x204   :  { %1106 = vsyncpa [#allocation6], 1 }
 0x205   :  { %1107 = vsyncpa [#allocation4], 1 }
 0x206   :  { %1108 = vsyncpa [#allocation10], 1 }

</bundles_post_ra>
